<compile_context>
chip_gen: v7x
topology: tpu7x:2x2x1
jax: 0.10.0
libtpu: 0.0.40
codegen_flags: <defaults>
</compile_context>

<pallas_src>
import functools

import jax
import jax.numpy as jnp
from jax.experimental import pallas as pl
from jax.experimental.pallas import tpu as pltpu

LANE = 128  # pad feature dims to the lane width for dense MXU / unmasked vst


def _round_up(x, m):
    return (x + m - 1) // m * m


@functools.lru_cache(maxsize=1)
def _vmem_limit_bytes():
    """Explicit scoped-VMEM limit (defaults are only 16/32 MiB).

    v5e/v6e (and older) have 128 MiB physical VMEM -> ask for 100 MiB.
    v7x has 64 MiB per TensorCore -> stay at a safe 56 MiB (also the fallback
    when the device kind is unknown)."""
    try:
        kind = jax.devices()[0].device_kind.lower()
    except Exception:  # pragma: no cover - no TPU visible at trace time
        kind = ""
    if any(v in kind for v in ("v2", "v3", "v4", "v5", "v6")):
        return 100 * 1024 * 1024
    return 56 * 1024 * 1024


def _spec(block_shape, index_map, buffered=None):
    """BlockSpec helper.  buffered=1 requests a single (resident) VMEM buffer
    for grid-invariant blocks; falls back to a plain BlockSpec if the
    pipeline_mode kwarg is unavailable in this JAX version."""
    if buffered is not None and hasattr(pl, "Buffered"):
        try:
            return pl.BlockSpec(block_shape, index_map,
                                pipeline_mode=pl.Buffered(buffered))
        except Exception:
            pass
    return pl.BlockSpec(block_shape, index_map)


# ----------------------------------------------------------------------------
# Hoisted feature transform: bf16 (rows(x), f_out_pad) = pad(x) @ pad(w),
# f32 accumulation, row-parallel grid.
# ----------------------------------------------------------------------------
def _feature_transform_kernel(x_ref, w_ref, o_ref):
    o_ref[...] = jnp.dot(x_ref[...], w_ref[...],
                         preferred_element_type=jnp.float32).astype(o_ref.dtype)


def _feature_transform(x, w, *, f_out_pad, max_tile_m=256):
    n, f_in = x.shape
    f_in_pad = _round_up(f_in, LANE)
    tile_m = _round_up(n, 8) if n <= max_tile_m else max_tile_m
    n_pad = _round_up(n, tile_m)

    x_p = jnp.zeros((n_pad, f_in_pad), jnp.bfloat16)
    x_p = x_p.at[:n, :f_in].set(x.astype(jnp.bfloat16))
    w_p = jnp.zeros((f_in_pad, f_out_pad), jnp.bfloat16)
    w_p = w_p.at[:w.shape[0], :w.shape[1]].set(w.astype(jnp.bfloat16))

    out = pl.pallas_call(
        _feature_transform_kernel,
        out_shape=jax.ShapeDtypeStruct((n_pad, f_out_pad), jnp.bfloat16),
        grid_spec=pltpu.PrefetchScalarGridSpec(
            num_scalar_prefetch=0,
            grid=(n_pad // tile_m,),
            in_specs=[
                pl.BlockSpec((tile_m, f_in_pad), lambda i: (i, 0)),
                _spec((f_in_pad, f_out_pad), lambda i: (0, 0), buffered=1),
            ],
            out_specs=pl.BlockSpec((tile_m, f_out_pad), lambda i: (i, 0)),
        ),
        compiler_params=pltpu.CompilerParams(
            dimension_semantics=("parallel",),
            vmem_limit_bytes=_vmem_limit_bytes()),
    )(x_p, w_p)
    return out[:n]


# ----------------------------------------------------------------------------
# Fused kernel: the whole GCN stack in one pallas_call (grid = layers).
# A_hat, the layer-0 features and the output block keep a constant block index
# (A_hat/x single-buffered residents); the activation carry lives in a bf16
# VMEM scratch; W_l/b_l are streamed per layer (double-buffered -> prefetch).
# ----------------------------------------------------------------------------
def _gcn_fused_kernel(a_ref, x_ref, w_ref, b_ref, o_ref, h_ref, *, num_layer):
    l = pl.program_id(0)

    @pl.when(l == 0)
    def _():  # load layer-0 features into the bf16 activation carry
        h_ref[...] = x_ref[...]

    # Feature transform once per layer, then aggregation with the resident
    # normalized adjacency.  Both matmuls: bf16 inputs, f32 accumulation.
    hw = jnp.dot(h_ref[...], w_ref[0], preferred_element_type=jnp.float32)
    out = jnp.dot(a_ref[...], hw.astype(jnp.bfloat16),
                  preferred_element_type=jnp.float32) + b_ref[0]

    @pl.when(l < num_layer - 1)
    def _():  # hidden layers: ReLU, carry stays resident in VMEM as bf16
        h_ref[...] = jnp.maximum(out, 0.0).astype(jnp.bfloat16)

    @pl.when(l == num_layer - 1)
    def _():  # last layer: raw logits
        o_ref[...] = out.astype(o_ref.dtype)


def gcn_forward_fused(a_hat, in_feat, params, dropout=0.0):
    """Whole-stack fused forward (small/medium N: resident set must fit VMEM)."""
    # TODO(synk): dropout > 0 would need pltpu.prng_seed/prng_random_bits
    # masking; with dropout=0.0, F.dropout is the identity.
    assert dropout == 0.0, "dropout > 0 not implemented in the Pallas kernel"

    n, f_in = in_feat.shape
    num_layer = len(params)
    n_classes = params[-1][0].shape[1]
    # Stack width = hidden/output width only (NOT the possibly huge input width).
    f_pad = _round_up(max(w.shape[1] for (w, _) in params), LANE)
    f_in_pad = _round_up(f_in, LANE)

    # Zero padding keeps padded feature columns exactly zero through every
    # layer (0 @ W = 0, + 0 bias, relu(0) = 0), so results are unchanged.
    w_stack = jnp.zeros((num_layer, f_pad, f_pad), jnp.bfloat16)
    b_stack = jnp.zeros((num_layer, 1, f_pad), jnp.float32)
    for li in range(1, num_layer):
        w, b = params[li]
        w_stack = w_stack.at[li, :w.shape[0], :w.shape[1]].set(
            w.astype(jnp.bfloat16))
        b_stack = b_stack.at[li, 0, :b.shape[0]].set(b)

    w0, b0 = params[0]
    b_stack = b_stack.at[0, 0, :b0.shape[0]].set(b0)
    if f_in_pad <= f_pad:
        # Input already fits the stack width: feed padded X and the real W0.
        x0 = jnp.zeros((n, f_pad), jnp.bfloat16).at[:, :f_in].set(
            in_feat.astype(jnp.bfloat16))
        w_stack = w_stack.at[0, :w0.shape[0], :w0.shape[1]].set(
            w0.astype(jnp.bfloat16))
    else:
        # in_feats >> hidden: hoist the layer-0 transform X @ W0, then run the
        # fused stack at the hidden width; layer-0's in-stack transform becomes
        # the identity (exact in bf16).
        x0 = _feature_transform(in_feat, w0, f_out_pad=f_pad)
        w_stack = w_stack.at[0].set(jnp.eye(f_pad, dtype=jnp.bfloat16))

    # TODO(synk): on v7x, A_hat could additionally be stored as float8_e4m3 to
    # halve the HBM traffic of the aggregation matmul.
    a_bf16 = a_hat.astype(jnp.bfloat16)

    kernel = functools.partial(_gcn_fused_kernel, num_layer=num_layer)
    out_pad = pl.pallas_call(
        kernel,
        out_shape=jax.ShapeDtypeStruct((n, f_pad), jnp.float32),
        grid_spec=pltpu.PrefetchScalarGridSpec(
            num_scalar_prefetch=0,
            grid=(num_layer,),
            in_specs=[
                _spec((n, n), lambda l: (0, 0), buffered=1),      # A_hat resident
                _spec((n, f_pad), lambda l: (0, 0), buffered=1),  # layer-0 feats
                pl.BlockSpec((1, f_pad, f_pad), lambda l: (l, 0, 0)),  # W_l
                pl.BlockSpec((1, 1, f_pad), lambda l: (l, 0, 0)),      # b_l
            ],
            out_specs=pl.BlockSpec((n, f_pad), lambda l: (0, 0)),
            scratch_shapes=[pltpu.VMEM((n, f_pad), jnp.bfloat16)],  # carry
        ),
        compiler_params=pltpu.CompilerParams(
            dimension_semantics=("arbitrary",),  # layers are sequential
            vmem_limit_bytes=_vmem_limit_bytes()),
    )(a_bf16, x0, w_stack, b_stack)
    return out_pad[:, :n_classes]


# ----------------------------------------------------------------------------
# Scalable tiled path (row-parallel + K-reduction grid, per layer).
# ----------------------------------------------------------------------------
def _gcn_layer_agg_first_kernel(a_ref, h_ref, w_ref, b_ref, o_ref, acc_ref,
                                *, tile_k, apply_relu):
    """(A @ H) @ W order: acc += A_tile @ H_chunk over k; finalize with W, b."""
    k = pl.program_id(1)

    @pl.when(k == 0)
    def _():
        acc_ref[...] = jnp.zeros_like(acc_ref)

    start = pl.multiple_of(k * tile_k, tile_k)
    acc_ref[...] += jnp.dot(a_ref[...], h_ref[pl.ds(start, tile_k), :],
                            preferred_element_type=jnp.float32)

    @pl.when(k == pl.num_programs(1) - 1)
    def _():
        out = jnp.dot(acc_ref[...].astype(jnp.bfloat16), w_ref[...],
                      preferred_element_type=jnp.float32) + b_ref[...]
        if apply_relu:
            out = jnp.maximum(out, 0.0)
        o_ref[...] = out.astype(o_ref.dtype)


def _gcn_layer_hw_first_kernel(a_ref, hw_ref, b_ref, o_ref, acc_ref,
                               *, tile_k, apply_relu):
    """A @ (H @ W) order with the hoisted HW kept resident in VMEM."""
    k = pl.program_id(1)

    @pl.when(k == 0)
    def _():  # fold the bias into the accumulator init
        acc_ref[...] = jnp.broadcast_to(b_ref[...], acc_ref.shape)

    start = pl.multiple_of(k * tile_k, tile_k)
    acc_ref[...] += jnp.dot(a_ref[...], hw_ref[pl.ds(start, tile_k), :],
                            preferred_element_type=jnp.float32)

    @pl.when(k == pl.num_programs(1) - 1)
    def _():
        out = acc_ref[...]
        if apply_relu:
            out = jnp.maximum(out, 0.0)
        o_ref[...] = out.astype(o_ref.dtype)


def gcn_layer_tiled(a_pad_bf16, h_pad_bf16, w, b, *, apply_relu, out_dtype,
                    tile_m, tile_k):
    n_pad = a_pad_bf16.shape[0]
    f_in_pad = h_pad_bf16.shape[1]
    f_out = w.shape[1]
    f_out_pad = _round_up(f_out, LANE)
    grid = (n_pad // tile_m, n_pad // tile_k)

    b_pad = jnp.zeros((1, f_out_pad), jnp.float32).at[0, :f_out].set(b)
    common = dict(
        out_shape=jax.ShapeDtypeStruct((n_pad, f_out_pad), out_dtype),
        compiler_params=pltpu.CompilerParams(
            dimension_semantics=("parallel", "arbitrary"),
            vmem_limit_bytes=_vmem_limit_bytes()),
    )

    if f_in_pad <= f_out_pad:
        # Single fused call per layer: stream A, keep H and W resident.
        w_pad = jnp.zeros((f_in_pad, f_out_pad), jnp.bfloat16)
        w_pad = w_pad.at[:w.shape[0], :f_out].set(w.astype(jnp.bfloat16))
        kernel = functools.partial(_gcn_layer_agg_first_kernel,
                                   tile_k=tile_k, apply_relu=apply_relu)
        out = pl.pallas_call(
            kernel,
            grid_spec=pltpu.PrefetchScalarGridSpec(
                num_scalar_prefetch=0,
                grid=grid,
                in_specs=[
                    pl.BlockSpec((tile_m, tile_k), lambda i, k: (i, k)),     # A tile
                    _spec((n_pad, f_in_pad), lambda i, k: (0, 0), buffered=1),   # H resident
                    _spec((f_in_pad, f_out_pad), lambda i, k: (0, 0), buffered=1),  # W
                    _spec((1, f_out_pad), lambda i, k: (0, 0), buffered=1),       # bias
                ],
                out_specs=pl.BlockSpec((tile_m, f_out_pad), lambda i, k: (i, 0)),
                scratch_shapes=[pltpu.VMEM((tile_m, f_in_pad), jnp.float32)],
            ),
            **common,
        )(a_pad_bf16, h_pad_bf16, w_pad, b_pad)
        return out, f_out

    # Wide input (f_in_pad > f_out_pad): hoist HW = H @ W once, then aggregate
    # with HW resident in VMEM (never re-streamed per row block).
    hw = _feature_transform(h_pad_bf16, w, f_out_pad=f_out_pad,
                            max_tile_m=tile_m)
    kernel = functools.partial(_gcn_layer_hw_first_kernel,
                               tile_k=tile_k, apply_relu=apply_relu)
    out = pl.pallas_call(
        kernel,
        grid_spec=pltpu.PrefetchScalarGridSpec(
            num_scalar_prefetch=0,
            grid=grid,
            in_specs=[
                pl.BlockSpec((tile_m, tile_k), lambda i, k: (i, k)),        # A tile
                _spec((n_pad, f_out_pad), lambda i, k: (0, 0), buffered=1),  # HW resident
                _spec((1, f_out_pad), lambda i, k: (0, 0), buffered=1),      # bias
            ],
            out_specs=pl.BlockSpec((tile_m, f_out_pad), lambda i, k: (i, 0)),
            scratch_shapes=[pltpu.VMEM((tile_m, f_out_pad), jnp.float32)],
        ),
        **common,
    )(a_pad_bf16, hw, b_pad)
    return out, f_out


def _grid_tiling(n):
    """Pick (n_pad, tile_m, tile_k): largest row/K tiles (<=256 / <=512) that
    divide the (zero-)padded node count."""
    if n <= 256:
        n_pad = _round_up(n, 8)
        return n_pad, n_pad, n_pad
    n_pad = _round_up(n, 128)
    tile_m = 256 if n_pad % 256 == 0 else 128
    tile_k = next(t for t in (512, 256, 128) if n_pad % t == 0)
    return n_pad, tile_m, tile_k


def gcn_forward_tiled(a_hat, in_feat, params, dropout=0.0):
    """Scalable per-layer path; VMEM bounded regardless of graph size and the
    row axis is 'parallel' (shards across both TensorCores on v7x)."""
    # TODO(synk): dropout > 0 would need pltpu.prng_random_bits masking.
    assert dropout == 0.0, "dropout > 0 not implemented in the Pallas kernel"
    n, f_in = in_feat.shape
    n_pad, tile_m, tile_k = _grid_tiling(n)
    f_in_pad = _round_up(f_in, LANE)

    # Zero rows/cols of A and zero feature rows keep the math exact; padded
    # rows never feed real rows (padded A columns are zero).
    a_pad = jnp.zeros((n_pad, n_pad), jnp.bfloat16)
    a_pad = a_pad.at[:n, :n].set(a_hat.astype(jnp.bfloat16))
    h = jnp.zeros((n_pad, f_in_pad), jnp.bfloat16)
    h = h.at[:n, :f_in].set(in_feat.astype(jnp.bfloat16))

    for (w, b) in params[:-1]:
        h, _ = gcn_layer_tiled(a_pad, h, w, b, apply_relu=True,
                               out_dtype=jnp.bfloat16,
                               tile_m=tile_m, tile_k=tile_k)
    w, b = params[-1]
    out, f_out = gcn_layer_tiled(a_pad, h, w, b, apply_relu=False,
                                 out_dtype=jnp.float32,
                                 tile_m=tile_m, tile_k=tile_k)
    return out[:n, :f_out]


# ----------------------------------------------------------------------------
# Dispatcher
# ----------------------------------------------------------------------------
def _fused_vmem_bytes(n, f_pad):
    a = n * n * 2                 # A_hat bf16, single buffer
    x = n * f_pad * 2             # layer-0 features bf16, single buffer
    carry = n * f_pad * 2         # bf16 activation carry scratch
    out = 2 * n * f_pad * 4       # f32 output, double-buffered
    w = 2 * f_pad * f_pad * 2     # per-layer weights, double-buffered
    return a + x + carry + out + w


def gcn_forward(a_hat, in_feat, params, dropout=0.0):
    """Whole-stack fused kernel when its resident set fits VMEM, else tiled."""
    n = a_hat.shape[0]
    f_pad = _round_up(max(w.shape[1] for (w, _) in params), LANE)
    if _fused_vmem_bytes(n, f_pad) <= int(0.8 * _vmem_limit_bytes()):
        return gcn_forward_fused(a_hat, in_feat, params, dropout)
    return gcn_forward_tiled(a_hat, in_feat, params, dropout)


# ----------------------------------------------------------------------------
# Parameters / graph construction (matching the PyTorch module layout)
# ----------------------------------------------------------------------------
def init_gcn_params(key, in_feats, h_feats, num_layer, num_classes):
    dims = [in_feats] + [h_feats] * (num_layer - 1) + [num_classes]
    params = []
    for li in range(num_layer):
        f_in, f_out = dims[li], dims[li + 1]
        key, wk = jax.random.split(key)
        limit = (6.0 / (f_in + f_out)) ** 0.5  # Glorot uniform (DGL default)
        w = jax.random.uniform(wk, (f_in, f_out), jnp.float32, -limit, limit)
        b = jnp.zeros((f_out,), jnp.float32)
        params.append((w, b))
    return params


def build_normalized_adjacency(key, num_nodes, avg_degree=4):
    """Dense symmetric adjacency with self-loops, normalized D^-1/2 A D^-1/2."""
    p = avg_degree / num_nodes
    upper = (jax.random.uniform(key, (num_nodes, num_nodes)) < p).astype(jnp.float32)
    adj = jnp.triu(upper, k=1)
    adj = adj + adj.T
    adj = adj + jnp.eye(num_nodes, dtype=jnp.float32)
    deg = adj.sum(axis=1)
    d_inv_sqrt = 1.0 / jnp.sqrt(deg)
    return adj * d_inv_sqrt[:, None] * d_inv_sqrt[None, :]


# References with the same bf16-input / f32-accumulate math as the kernels,
# and pure-f32 math for a loose sanity check.
def gcn_reference_bf16(a_hat, in_feat, params):
    a_bf = a_hat.astype(jnp.bfloat16)
    h = in_feat
    for li, (w, b) in enumerate(params):
        hw = jnp.dot(h.astype(jnp.bfloat16), w.astype(jnp.bfloat16),
                     preferred_element_type=jnp.float32)
        h = jnp.dot(a_bf, hw.astype(jnp.bfloat16),
                    preferred_element_type=jnp.float32) + b
        if li < len(params) - 1:
            h = jnp.maximum(h, 0.0)
    return h


def gcn_reference_f32(a_hat, in_feat, params):
    h = in_feat
    for li, (w, b) in enumerate(params):
        h = a_hat @ (h @ w) + b
        if li < len(params) - 1:
            h = jnp.maximum(h, 0.0)
    return h


def _check(out, ref_bf, ref_f32, n, c):
    assert out.shape == (n, c), out.shape
    assert jnp.max(jnp.abs(out - ref_bf)) < 5e-2
    rel = jnp.linalg.norm(out - ref_f32) / jnp.linalg.norm(ref_f32)
    assert rel < 2e-2, rel


if __name__ == "__main__":
    key = jax.random.PRNGKey(0)

    # Config 1: in_feats == hidden (square pad) -> direct fused path and the
    # fused (A@H)@W-order tiled path.
    k_graph, k_feat, k_param, key = jax.random.split(key, 4)
    num_nodes, in_feats, h_feats, num_layer, num_classes = 256, 32, 32, 3, 16
    a_hat = build_normalized_adjacency(k_graph, num_nodes)
    x = jax.random.normal(k_feat, (num_nodes, in_feats), jnp.float32)
    params = init_gcn_params(k_param, in_feats, h_feats, num_layer, num_classes)
    ref_bf = gcn_reference_bf16(a_hat, x, params)
    ref_f32 = gcn_reference_f32(a_hat, x, params)
    for fn in (gcn_forward, gcn_forward_fused, gcn_forward_tiled):
        out = jax.block_until_ready(fn(a_hat, x, params, dropout=0.0))
        _check(out, ref_bf, ref_f32, num_nodes, num_classes)

    # Config 2: in_feats >> hidden and N not a multiple of 128 -> exercises the
    # hoisted layer-0 transform (fused) and the resident-HW tiled branch.
    k_graph, k_feat, k_param, key = jax.random.split(key, 4)
    num_nodes, in_feats, h_feats, num_layer, num_classes = 200, 300, 48, 2, 7
    a_hat = build_normalized_adjacency(k_graph, num_nodes)
    x = jax.random.normal(k_feat, (num_nodes, in_feats), jnp.float32)
    params = init_gcn_params(k_param, in_feats, h_feats, num_layer, num_classes)
    ref_bf = gcn_reference_bf16(a_hat, x, params)
    ref_f32 = gcn_reference_f32(a_hat, x, params)
    for fn in (gcn_forward_fused, gcn_forward_tiled):
        out = jax.block_until_ready(fn(a_hat, x, params, dropout=0.0))
        _check(out, ref_bf, ref_f32, num_nodes, num_classes)

    print("KERNEL_OK")
</pallas_src>

<mosaic_0001>
module attributes {stable_mosaic.version = 11 : i64} {
  func.func @_gcn_fused_kernel(%arg0: i32, %arg1: memref<256x256xbf16, #tpu.memory_space<vmem>>, %arg2: memref<256x128xbf16, #tpu.memory_space<vmem>>, %arg3: memref<1x128x128xbf16, #tpu.memory_space<vmem>>, %arg4: memref<1x1x128xf32, #tpu.memory_space<vmem>>, %arg5: memref<256x128xf32, #tpu.memory_space<vmem>>, %arg6: memref<256x128xbf16, #tpu.memory_space<vmem>>) attributes {dimension_semantics = [#tpu.dimension_semantics<arbitrary>], iteration_bounds = array<i64: 3>, scalar_prefetch = 0 : i64, scratch_operands = 1 : i64, tpu.core_type = #tpu.core_type<tc>, window_params = [{pipeline_mode = #tpu.pipeline_mode<synchronous>, transform_indices = @transform_0, window_bounds = array<i64: 256, 256>}, {pipeline_mode = #tpu.pipeline_mode<synchronous>, transform_indices = @transform_1, window_bounds = array<i64: 256, 128>}, {transform_indices = @transform_2, window_bounds = array<i64: 1, 128, 128>}, {transform_indices = @transform_3, window_bounds = array<i64: 1, 1, 128>}, {pipeline_mode = #tpu.pipeline_mode<synchronous>, transform_indices = @transform_4, window_bounds = array<i64: 256, 128>}]} {
    %c0_i32 = arith.constant 0 : i32
    %0 = arith.cmpi eq, %arg0, %c0_i32 : i32
    %1 = arith.extui %0 : i1 to i32
    %c0_i32_0 = arith.constant 0 : i32
    %2 = arith.cmpi ne, %1, %c0_i32_0 : i32
    scf.if %2 {
      %c0_14 = arith.constant 0 : index
      %c0_15 = arith.constant 0 : index
      %20 = vector.load %arg2[%c0_14, %c0_15] : memref<256x128xbf16, #tpu.memory_space<vmem>>, vector<256x128xbf16>
      %c0_16 = arith.constant 0 : index
      %c0_17 = arith.constant 0 : index
      %21 = vector.load %arg6[%c0_16, %c0_17] : memref<256x128xbf16, #tpu.memory_space<vmem>>, vector<256x128xbf16>
      tpu.vector_store %arg6[%c0_16, %c0_17], %20 {strides = array<i32>} : memref<256x128xbf16, #tpu.memory_space<vmem>>, vector<256x128xbf16>,
    } else {
    }
    %c0 = arith.constant 0 : index
    %c0_1 = arith.constant 0 : index
    %3 = vector.load %arg6[%c0, %c0_1] : memref<256x128xbf16, #tpu.memory_space<vmem>>, vector<256x128xbf16>
    %c0_2 = arith.constant 0 : index
    %c0_3 = arith.constant 0 : index
    %c0_4 = arith.constant 0 : index
    %4 = vector.load %arg3[%c0_2, %c0_3, %c0_4] : memref<1x128x128xbf16, #tpu.memory_space<vmem>>, vector<1x128x128xbf16>
    %5 = vector.shape_cast %4 : vector<1x128x128xbf16> to vector<128x128xbf16>
    %cst = arith.constant dense<0.000000e+00> : vector<256x128xf32>
    %6 = tpu.matmul %3, %5, %cst {dimension_numbers = #tpu.dot_dimension_numbers<[1], [0], [0], [1], [0, 0, 1, 1], [], []>} : vector<256x128xbf16>, vector<128x128xbf16>, vector<256x128xf32> -> vector<256x128xf32>
    %c0_5 = arith.constant 0 : index
    %c0_6 = arith.constant 0 : index
    %7 = vector.load %arg1[%c0_5, %c0_6] : memref<256x256xbf16, #tpu.memory_space<vmem>>, vector<256x256xbf16>
    %8 = arith.truncf %6 : vector<256x128xf32> to vector<256x128xbf16>
    %cst_7 = arith.constant dense<0.000000e+00> : vector<256x128xf32>
    %9 = tpu.matmul %7, %8, %cst_7 {dimension_numbers = #tpu.dot_dimension_numbers<[1], [0], [0], [1], [0, 0, 1, 1], [], []>} : vector<256x256xbf16>, vector<256x128xbf16>, vector<256x128xf32> -> vector<256x128xf32>
    %c0_8 = arith.constant 0 : index
    %c0_9 = arith.constant 0 : index
    %c0_10 = arith.constant 0 : index
    %10 = vector.load %arg4[%c0_8, %c0_9, %c0_10] : memref<1x1x128xf32, #tpu.memory_space<vmem>>, vector<1x1x128xf32>
    %11 = vector.shape_cast %10 : vector<1x1x128xf32> to vector<1x128xf32>
    %12 = vector.broadcast %11 : vector<1x128xf32> to vector<256x128xf32>
    %13 = arith.addf %9, %12 : vector<256x128xf32>
    %c2_i32 = arith.constant 2 : i32
    %14 = arith.cmpi slt, %arg0, %c2_i32 : i32
    %15 = arith.extui %14 : i1 to i32
    %c0_i32_11 = arith.constant 0 : i32
    %16 = arith.cmpi ne, %15, %c0_i32_11 : i32
    scf.if %16 {
      %cst_14 = arith.constant 0.000000e+00 : f32
      %20 = vector.broadcast %cst_14 : f32 to vector<256x128xf32>
      %21 = arith.maximumf %13, %20 : vector<256x128xf32>
      %22 = arith.truncf %21 : vector<256x128xf32> to vector<256x128xbf16>
      %c0_15 = arith.constant 0 : index
      %c0_16 = arith.constant 0 : index
      %23 = vector.load %arg6[%c0_15, %c0_16] : memref<256x128xbf16, #tpu.memory_space<vmem>>, vector<256x128xbf16>
      tpu.vector_store %arg6[%c0_15, %c0_16], %22 {strides = array<i32>} : memref<256x128xbf16, #tpu.memory_space<vmem>>, vector<256x128xbf16>,
    } else {
    }
    %c2_i32_12 = arith.constant 2 : i32
    %17 = arith.cmpi eq, %arg0, %c2_i32_12 : i32
    %18 = arith.extui %17 : i1 to i32
    %c0_i32_13 = arith.constant 0 : i32
    %19 = arith.cmpi ne, %18, %c0_i32_13 : i32
    scf.if %19 {
      %c0_14 = arith.constant 0 : index
      %c0_15 = arith.constant 0 : index
      %20 = vector.load %arg5[%c0_14, %c0_15] : memref<256x128xf32, #tpu.memory_space<vmem>>, vector<256x128xf32>
      tpu.vector_store %arg5[%c0_14, %c0_15], %13 {strides = array<i32>} : memref<256x128xf32, #tpu.memory_space<vmem>>, vector<256x128xf32>,
    } else {
    }
    return
  }
  func.func @transform_0(%arg0: i32) -> (i32, i32) {
    %c0_i32 = arith.constant 0 : i32
    %c0_i32_0 = arith.constant 0 : i32
    %c0_i32_1 = arith.constant 0 : i32
    return %c0_i32, %c0_i32_0 : i32, i32
  }
  func.func @transform_1(%arg0: i32) -> (i32, i32) {
    %c0_i32 = arith.constant 0 : i32
    %c0_i32_0 = arith.constant 0 : i32
    %c0_i32_1 = arith.constant 0 : i32
    return %c0_i32, %c0_i32_0 : i32, i32
  }
  func.func @transform_2(%arg0: i32) -> (i32, i32, i32) {
    %c0_i32 = arith.constant 0 : i32
    %c0_i32_0 = arith.constant 0 : i32
    %c0_i32_1 = arith.constant 0 : i32
    return %arg0, %c0_i32, %c0_i32_0 : i32, i32, i32
  }
  func.func @transform_3(%arg0: i32) -> (i32, i32, i32) {
    %c0_i32 = arith.constant 0 : i32
    %c0_i32_0 = arith.constant 0 : i32
    %c0_i32_1 = arith.constant 0 : i32
    return %arg0, %c0_i32, %c0_i32_0 : i32, i32, i32
  }
  func.func @transform_4(%arg0: i32) -> (i32, i32) {
    %c0_i32 = arith.constant 0 : i32
    %c0_i32_0 = arith.constant 0 : i32
    %c0_i32_1 = arith.constant 0 : i32
    return %c0_i32, %c0_i32_0 : i32, i32
  }
}

</mosaic_0001>

<bundles_post_ra>
// kernel: tpu_custom_call.1
= control target key start
LH: loop header
LB: loop body
LE: loop exit
PB: predicated region body
PF: predicated region fallthrough
CT: control target
= control target key end

     0   :  { %9 = vsyncpa [#allocation4], 0  ;;  %s2213_s0 = inlined_call_operand.hbm [shape: bf16[256,256], index: 0, kind: input, shape index: {}]   ;;  %s2214_s1 = inlined_call_operand.hbm [shape: bf16[256,128], index: 1, kind: input, shape index: {}]   ;;  %s2215_s2 = inlined_call_operand.hbm [shape: bf16[3,128,128], index: 2, kind: input, shape index: {}]   ;;  %s2216_s3 = inlined_call_operand.vmem [shape: f32[3,1,128], index: 3, kind: input, shape index: {}]   ;;  %s2217_s4 = inlined_call_operand.hbm [shape: f32[256,128], index: 4, kind: output, shape index: {}]  }
   0x1   :  { %10 = vsyncpa [#allocation7], 0 }
   0x2   :  { %11 = vsyncpa [#allocation5], 0  ;;  %s1819_s15 = smov 0   ;;  %s1821_s16 = smov 0  }
   0x3   :  { %s1823_s17 = smov 0   ;;  %s1825_s18 = smov 0  }
   0x4 LB: > { %s1838_s19 = sadd.s32 4294967295, %s1782_s18   ;;  %s1841_s20 = sadd.s32 1, %s1782_s18   ;;  %s1782_s18 = sphi %s1825_s18, %s2238_s18   ;;  %s1778_s17 = sphi %s1823_s17, %s2237_s17   ;;  %s1774_s16 = sphi %s1821_s16, %s2236_s16   ;;  %s1770_s15 = sphi %s1819_s15, %s2235_s15  }
   0x5   : > { %s63_s21 = ssub.s32 %s1782_s18, %s1841_s20  ;;  %s66_s22 = sadd.s32 1, %s1778_s17 }
   0x6   : > { %p64_p0 = scmp.eq.s32.totalorder %s63_s21, 0  ;;  %p73_p1 = scmp.ne.s32.totalorder %s1778_s17, %s1774_s16 }
   0x7   : > { %p74_p2 = scmp.eq.s32.totalorder %s1782_s18, 0  ;;  %p79_p3 = scmp.ne.s32.totalorder %s1774_s16, %s1770_s15 }
   0x8   : > { %s1851_s23 = scalar_select %p64_p0, %s1778_s17, %s66_s22  }
   0x9   : > { %p1853_p4 = por %p74_p2, %p73_p1  ;;  %p2218_p5 = scmp.eq.s32.totalorder %s1838_s19, 0 }
   0xa   : > { %p1203_p6 = scmp.ge.s32.totalorder %s1782_s18, 1  ;;  %p137_p7 = scmp.lt.s32.totalorder %s1782_s18, 4 }
   0xb   : > { %p1862_p8 = por %p2218_p5, %p79_p3  ;;  %s1784_s27 = smov [#allocation3]  }
   0xc   : > { %p1867_p10 = pnand %p1203_p6, %p137_p7  ;;  %s149_s28 = sshll.u32 %s1784_s27, 4  ;;  %s150_s28 = int_to_ptr.vmem [resolvable:$true] %s149_s28 }
   0xd   : > { %s2223_s25 = scalar_select %p1862_p8, 1, 0 }
   0xe   : > { %s2224_s26 = scalar_select %p1867_p10, 1, 0 }
   0xf   : > { %p1493_p11 = pneg %p1867_p10  ;;  %p1506_p13 = scmp.lt.s32.totalorder %s1782_s18, 3 }
  0x10   : > { %s1624_s7 = scalar_lea.hbm %s2213_s0, 4096 }
  0x11   : > { %p1875_p12 = pnand %p1493_p11, %p2218_p5  ;;  %p1882_p0 = pnand %p1506_p13, %p1853_p4 }
  0x12   : > { %p1625_p1 = scmp.ne.s32.totalorder %s2213_s0, %s1624_s7  ;;  %p1631_p4 = scmp.lt.u32.totalorder %s1624_s7, %s2213_s0 }
  0x13   : > { %s2226_s30 = scalar_select %p1882_p0, 1, 0 }
  0x14   : > { %p1626_p2 = pneg %p1875_p12 }
  0x16   : > { %p1627_p3 = pnand %p1626_p2, %p1625_p1 }
  0x18   : > { %p1628_p6 = pneg %p1627_p3 }
  0x1a   : > { %p1633_p7 = pnand %p1631_p4, %p1628_p6 }
  0x1c   : > { %1636 = shalt.err (!%p1633_p7)
}
  0x1d   : > { %s1637_s12 = scalar_lea.vmem %s150_s28, 4096  ;;  %p1645_p5 = scmp.lt.s32.totalorder %s150_s28, %s150_s28 }
  0x1e   : > { %p1638_p11 = scmp.ne.s32.totalorder %s150_s28, %s1637_s12  ;;  %p1646_p8 = scmp.lt.s32.totalorder %s1637_s12, %s1637_s12 }
  0x20   : > { %p1640_p13 = pnand %p1638_p11, %p1626_p2  ;;  %p1647_p10 = por %p1646_p8, %p1645_p5 }
  0x22   : > { %p1641_p9 = pneg %p1640_p13 }
  0x24   : > { %p1648_p0 = pnand %p1647_p10, %p1641_p9 }
  0x26   : > { %1651 = shalt.err (!%p1648_p0)
}
  0x27   : > { %s1785_s13 = smov 128   ;;  %s1786_s14 = smov 8  }
  0x28   : > { %1496 = dma.hbm_to_vmem [thread:$0]  (!%p1875_p12), %s2213_s0, 4096, %s150_s28, [#allocation4], %s1785_s13, %s1785_s13, %s1786_s14  }
  0x29   : > { %s1787_s22 = smov [#allocation6]   ;;  %s1652_s6 = scalar_lea.hbm %s2214_s1, 2048 }
  0x2a   : > { %s162_s24 = sshll.u32 %s1787_s22, 4  ;;  %p1653_p5 = scmp.ne.s32.totalorder %s2214_s1, %s1652_s6  ;;  %s163_s24 = int_to_ptr.vmem [resolvable:$true] %s162_s24 }
  0x2b   : > { %p1659_p10 = scmp.lt.u32.totalorder %s1652_s6, %s2214_s1 }
  0x2c   : > { %p1655_p8 = pnand %p1653_p5, %p1626_p2 }
  0x2e   : > { %p1656_p9 = pneg %p1655_p8 }
  0x30   : > { %p1661_p0 = pnand %p1659_p10, %p1656_p9 }
  0x32   : > { %1664 = shalt.err (!%p1661_p0)
}
  0x33   : > { %s1665_s28 = scalar_lea.vmem %s163_s24, 2048  ;;  %p1673_p4 = scmp.lt.s32.totalorder %s163_s24, %s163_s24 }
  0x34   : > { %p1666_p1 = scmp.ne.s32.totalorder %s163_s24, %s1665_s28  ;;  %p1674_p7 = scmp.lt.s32.totalorder %s1665_s28, %s1665_s28 }
  0x36   : > { %p1668_p3 = pnand %p1666_p1, %p1626_p2  ;;  %p1675_p11 = por %p1674_p7, %p1673_p4 }
  0x38   : > { %p1669_p6 = pneg %p1668_p3 }
  0x3a   : > { %p1676_p13 = pnand %p1675_p11, %p1669_p6 }
  0x3c   : > { %1679 = shalt.err (!%p1676_p13)
}
  0x3d   : > { %s1788_s11 = smov 64   ;;  %s1789_s12 = smov 4  }
  0x3e   : > { %1499 = dma.hbm_to_vmem [thread:$0]  (!%p1875_p12), %s2214_s1, 2048, %s163_s24, [#allocation7], %s1788_s11, %s1788_s11, %s1789_s12  }
  0x3f   : > { %s176_s15 = sand.u32 1, %s1782_s18   ;;  %s178_s21 = sand.u32 1, %s1778_s17  }
  0x40   : > { %s1207_s22 = sshll.u32 %s178_s21, 6  ;;  %s1278_s27 = sshll.u32 %s1782_s18, 10 }
  0x41   : > { %s1937_s7 = scalar_lea.hbm %s2215_s2, %s1278_s27  ;;  %s180_s29 = scalar_lea.vmem [#allocation8], %s1207_s22 }
  0x42   : > { %s187_s8 = sshll.u32 %s180_s29, 4  ;;  %s1941_s9 = scalar_lea.sflag [#allocation4], %s176_s15  ;;  %s1939_s8 = int_to_ptr.vmem [resolvable:$true] %s187_s8 }
  0x43   : > { %s1680_s24 = scalar_lea.hbm %s1937_s7, 1024  ;;  %p2227_p2 = scmp.ne.s32.totalorder %s2226_s30, 0 }
  0x44   : > { %p1681_p12 = scmp.ne.s32.totalorder %s1937_s7, %s1680_s24  ;;  %s1685_s28 = scalar_lea.hbm %s2215_s2, 3072 }
  0x45   : > { %p1682_p5 = pneg %p2227_p2  ;;  %p1686_p10 = scmp.lt.u32.totalorder %s1937_s7, %s2215_s2 }
  0x46   : > { %p1687_p0 = scmp.lt.u32.totalorder %s1685_s28, %s1680_s24  ;;  %p1689_p3 = scmp.lt.u32.totalorder %s1680_s24, %s1937_s7 }
  0x47   : > { %p1683_p8 = pnand %p1682_p5, %p1681_p12 }
  0x48   : > { %p1688_p1 = por %p1687_p0, %p1686_p10 }
  0x49   : > { %p1684_p9 = pneg %p1683_p8 }
  0x4a   : > { %p1690_p6 = por %p1689_p3, %p1688_p1 }
  0x4c   : > { %p1691_p4 = pnand %p1690_p6, %p1684_p9 }
  0x4e   : > { %1694 = shalt.err (!%p1691_p4)
}
  0x4f   : > { %s1695_s15 = scalar_lea.vmem %s1939_s8, 1024  ;;  %s1790_s21 = smov [#allocation8]  }
  0x50   : > { %p1696_p7 = scmp.ne.s32.totalorder %s1939_s8, %s1695_s15  ;;  %s1700_s22 = sshll.u32 %s1790_s21, 4  ;;  %s1701_s22 = int_to_ptr.vmem [resolvable:$false] %s1700_s22 }
  0x51   : > { %s1702_s27 = scalar_lea.vmem %s1701_s22, 2048  ;;  %p1703_p12 = scmp.lt.s32.totalorder %s1939_s8, %s1701_s22 }
  0x52   : > { %p1698_p11 = pnand %p1696_p7, %p1682_p5  ;;  %p1704_p8 = scmp.lt.s32.totalorder %s1702_s27, %s1695_s15 }
  0x54   : > { %p1699_p13 = pneg %p1698_p11  ;;  %p1705_p10 = por %p1704_p8, %p1703_p12 }
  0x56   : > { %p1706_p0 = pnand %p1705_p10, %p1699_p13 }
  0x58   : > { %1709 = shalt.err (!%p1706_p0)
}
  0x59   : > { %1503 = dma.hbm_to_vmem [thread:$0]  (!%p2227_p2), %s1937_s7, 1024, %s1939_s8, %s1941_s9, %s1788_s11, %s1788_s11, %s1789_s12  }
  0x5a   : > { %p2228_p5 = scmp.ne.s32.totalorder %s2224_s26, 0 }
  0x5b   : > { %p2229_p9 = scmp.eq.s32.totalorder (!%p2228_p5), %s1838_s19, 0 }
  0x5c   : > { %205 = sbr.rel (%p2228_p5) target bundleno = 791 (0x317), region = 36 }
  0x63   : > { %1753 = dma.done.wait (%p2229_p9), [#allocation4], 4096   ;;  %p2230_p1 = pmov %p2229_p9 }
  0x65   : > { %1755 = vsyncadd (%p2230_p1), [#allocation4], 4294963200  ;;  %p2231_p3 = pmov %p2230_p1 }
  0x66   : > { %p2232_p6 = pmov %p2230_p1 }
  0x67   : > { %1757 = dma.done.wait (%p2231_p3), [#allocation7], 2048  }
  0x68   : > { %1759 = vsyncadd (%p2232_p6), [#allocation7], 4294965248  ;;  %s215_s30 = sand.u32 1, %s1838_s19   ;;  %s217_s11 = sand.u32 1, %s1774_s16  }
  0x69   : > { %s1213_s12 = sshll.u32 %s217_s11, 6  ;;  %s216_s26 = scalar_lea.sflag [#allocation4], %s215_s30 }
  0x6a   : > { %s1984_s5 = scalar_lea.vmem [#allocation8], %s1213_s12  ;;  %p2233_p2 = scmp.ne.s32.totalorder %s2223_s25, 0 }
  0x6c   : > { %1761 = dma.done.wait (%p2233_p2), %s216_s26, 1024  }
  0x6d   : > { %1763 = vsyncadd (%p2233_p2), %s216_s26, 4294966272  ;;  %p242_p4 = scmp.lt.s32.totalorder %s1838_s19, 2  ;;  %p2234_p7 = scmp.ne.s32.totalorder %s1838_s19, 0 }
  0x6e   : > { %v1552_v0 = vld [vmem:[#allocation6] sm:$0xff] (!%p2234_p7)   ;;  %v1553_v1 = vld [vmem:[#allocation6 + $0x8] sm:$0xff] (!%p2234_p7)   ;;  %v1554_v2 = vld [vmem:[#allocation6 + $0x10] sm:$0xff] (!%p2234_p7)  }
  0x6f   : > { %s1992_s6 = scalar_select %p242_p4, %s1838_s19, 2 }
  0x70   : > { %249 = sbr.rel (%p2234_p7) target bundleno = 120 (0x78), region = 52  ;;  %378 = vst [vmem:[#allocation2] sm:$0xff] (!%p2234_p7), %v1552_v0  ;;  %379 = vst [vmem:[#allocation2 + $0x8] sm:$0xff] (!%p2234_p7), %v1553_v1  ;;  %v1555_v3 = vld [vmem:[#allocation6 + $0x18] sm:$0xff] (!%p2234_p7)   ;;  %v1556_v4 = vld [vmem:[#allocation6 + $0x20] sm:$0xff] (!%p2234_p7)  }
  0x71   : > { %s244_s8 = scalar_lea.vmem %s2216_s3, %s1992_s6  ;;  %380 = vst [vmem:[#allocation2 + $0x10] sm:$0xff] (!%p2234_p7), %v1554_v2  ;;  %381 = vst [vmem:[#allocation2 + $0x18] sm:$0xff] (!%p2234_p7), %v1555_v3  ;;  %v1557_v5 = vld [vmem:[#allocation6 + $0x28] sm:$0xff] (!%p2234_p7)   ;;  %v1558_v6 = vld [vmem:[#allocation6 + $0x30] sm:$0xff] (!%p2234_p7)  }
  0x72   : > { %382 = vst [vmem:[#allocation2 + $0x20] sm:$0xff] (!%p2234_p7), %v1556_v4  ;;  %383 = vst [vmem:[#allocation2 + $0x28] sm:$0xff] (!%p2234_p7), %v1557_v5  ;;  %v1559_v7 = vld [vmem:[#allocation6 + $0x38] sm:$0xff] (!%p2234_p7)   ;;  %v1560_v8 = vld [vmem:[#allocation6 + $0x40] sm:$0xff] (!%p2234_p7)  }
  0x73   : > { %384 = vst [vmem:[#allocation2 + $0x30] sm:$0xff] (!%p2234_p7), %v1558_v6  ;;  %385 = vst [vmem:[#allocation2 + $0x38] sm:$0xff] (!%p2234_p7), %v1559_v7  ;;  %v1561_v9 = vld [vmem:[#allocation6 + $0x48] sm:$0xff] (!%p2234_p7)   ;;  %v1562_v10 = vld [vmem:[#allocation6 + $0x50] sm:$0xff] (!%p2234_p7)  }
  0x74   : > { %386 = vst [vmem:[#allocation2 + $0x40] sm:$0xff] (!%p2234_p7), %v1560_v8  ;;  %387 = vst [vmem:[#allocation2 + $0x48] sm:$0xff] (!%p2234_p7), %v1561_v9  ;;  %v1563_v11 = vld [vmem:[#allocation6 + $0x58] sm:$0xff] (!%p2234_p7)   ;;  %v1564_v12 = vld [vmem:[#allocation6 + $0x60] sm:$0xff] (!%p2234_p7)  }
  0x75   : > { %388 = vst [vmem:[#allocation2 + $0x50] sm:$0xff] (!%p2234_p7), %v1562_v10  ;;  %389 = vst [vmem:[#allocation2 + $0x58] sm:$0xff] (!%p2234_p7), %v1563_v11  ;;  %v1565_v13 = vld [vmem:[#allocation6 + $0x68] sm:$0xff] (!%p2234_p7)   ;;  %v1566_v14 = vld [vmem:[#allocation6 + $0x70] sm:$0xff] (!%p2234_p7)  }
  0x76   : > { %390 = vst [vmem:[#allocation2 + $0x60] sm:$0xff] (!%p2234_p7), %v1564_v12  ;;  %391 = vst [vmem:[#allocation2 + $0x68] sm:$0xff] (!%p2234_p7), %v1565_v13  ;;  %v1567_v15 = vld [vmem:[#allocation6 + $0x78] sm:$0xff] (!%p2234_p7)  }
  0x77   : > { %392 = vst [vmem:[#allocation2 + $0x70] sm:$0xff] %v1566_v14  ;;  %393 = vst [vmem:[#allocation2 + $0x78] sm:$0xff] %v1567_v15 }
  0x78 PF: > { %v1568_v16 = vld [vmem:[%s1984_s5] sm:$0xff]   ;;  %v1569_v17 = vld [vmem:[%s1984_s5 + $0x8] sm:$0xff]   ;;  %v1570_v18 = vld [vmem:[%s1984_s5 + $0x10] sm:$0xff]   ;;  %p1272_p11 = scmp.ge.s32.totalorder %s1838_s19, 2 }
  0x79   : > { %1415 = vmatprep.subr.bf16.mxu0 %v1568_v16  ;;  %v1571_v19 = vld [vmem:[%s1984_s5 + $0x18] sm:$0xff]   ;;  %v394_v20 = vld [vmem:[#allocation2] sm:$0xff]  ;;  %v1573_v22 = vld [vmem:[%s1984_s5 + $0x28] sm:$0xff]  }
  0x7a   : > { %1416 = vmatpush3.bf16.msra.mxu0 %v1568_v16  ;;  %1431 = vmatprep.mubr.bf16.mxu0 %v394_v20  ;;  %v1572_v21 = vld [vmem:[%s1984_s5 + $0x20] sm:$0xff]   ;;  %v1574_v23 = vld [vmem:[%s1984_s5 + $0x30] sm:$0xff]   ;;  %v1575_v24 = vld [vmem:[%s1984_s5 + $0x38] sm:$0xff]  }
  0x7b   : > { %1417 = vmatprep.subr.bf16.mxu0 %v1569_v17  ;;  %v395_v25 = vld [vmem:[#allocation2 + $0x8] sm:$0xff]  ;;  %v396_v26 = vld [vmem:[#allocation2 + $0x10] sm:$0xff]  ;;  %v397_v27 = vld [vmem:[#allocation2 + $0x18] sm:$0xff] }
  0x7c   : > { %v398_v28 = vld [vmem:[#allocation2 + $0x20] sm:$0xff]  ;;  %v399_v29 = vld [vmem:[#allocation2 + $0x28] sm:$0xff]  ;;  %v400_v30 = vld [vmem:[#allocation2 + $0x30] sm:$0xff] }
  0x7d   : > { %v401_v31 = vld [vmem:[#allocation2 + $0x38] sm:$0xff]  ;;  %v402_v32 = vld [vmem:[#allocation2 + $0x40] sm:$0xff]  ;;  %v403_v33 = vld [vmem:[#allocation2 + $0x48] sm:$0xff] }
  0x7e   : > { %1418 = vmatpush3.bf16.msra.mxu0 %v1569_v17  ;;  %v404_v34 = vld [vmem:[#allocation2 + $0x50] sm:$0xff]  ;;  %v405_v35 = vld [vmem:[#allocation2 + $0x58] sm:$0xff]  ;;  %v406_v36 = vld [vmem:[#allocation2 + $0x60] sm:$0xff] }
  0x7f   : > { %1419 = vmatprep.subr.bf16.mxu0 %v1570_v18  ;;  %v407_v37 = vld [vmem:[#allocation2 + $0x68] sm:$0xff]  ;;  %v408_v38 = vld [vmem:[#allocation2 + $0x70] sm:$0xff]  ;;  %v409_v39 = vld [vmem:[#allocation2 + $0x78] sm:$0xff] }
  0x80   : > { %v1578_v40 = vld [vmem:[#allocation3 + $0x44] ss:$8 sps:$4 sm:$0xff]  }
  0x81   : > { %914 = vmatprep.mubr.bf16.mxu1 %v1578_v40  ;;  %v1602_v41 = vld [vmem:[#allocation3 + $0x4] ss:$8 sps:$4 sm:$0xff]  }
  0x82   : > { %1420 = vmatpush3.bf16.msra.mxu0 %v1570_v18  ;;  %v1588_v40 = vld [vmem:[#allocation3 + $0x84] ss:$8 sps:$4 sm:$0xff]  }
  0x83   : > { %1421 = vmatprep.subr.bf16.mxu0 %v1571_v19 }
  0x86   : > { %1422 = vmatpush3.bf16.msra.mxu0 %v1571_v19 }
  0x87   : > { %1423 = vmatprep.subr.bf16.mxu0 %v1572_v21 }
  0x8a   : > { %1424 = vmatpush3.bf16.msra.mxu0 %v1572_v21 }
  0x8b   : > { %1425 = vmatprep.subr.bf16.mxu0 %v1573_v22 }
  0x8e   : > { %1426 = vmatpush3.bf16.msra.mxu0 %v1573_v22 }
  0x8f   : > { %1427 = vmatprep.subr.bf16.mxu0 %v1574_v23 }
  0x92   : > { %1428 = vmatpush3.bf16.msra.mxu0 %v1574_v23 }
  0x93   : > { %1429 = vmatprep.subr.bf16.mxu0 %v1575_v24 }
  0x96   : > { %1430 = vmatpush3.bf16.msra.mxu0 %v1575_v24 }
  0x99   : > { %1432 = vmatmul.mubr.bf16.vlgmr.msra.gmra.mrb[0].mxu0 %v395_v25 }
  0x9a   : > { %1435 = vmatprep.mubr.bf16.mxu0 %v396_v26  ;;  %v1576_v26 = vld [vmem:[#allocation3 + $0x40] ss:$8 sps:$4 sm:$0xff]  }
  0xa1   : > { %1436 = vmatmul.mubr.bf16.gmra.mrb[4].mxu0 %v397_v27  ;;  %v1600_v27 = vld [vmem:[#allocation3] ss:$8 sps:$4 sm:$0xff]  }
  0xa2   : > { %1439 = vmatprep.mubr.bf16.mxu0 %v398_v28  ;;  %v1579_v28 = vld [vmem:[#allocation3 + $0x54] ss:$8 sps:$4 sm:$0xff]  }
  0xa9   : > { %1440 = vmatmul.mubr.bf16.gmra.mrb[8].mxu0 %v399_v29  ;;  %v1606_v29 = vld [vmem:[#allocation3 + $0x14] ss:$8 sps:$4 sm:$0xff]  }
  0xaa   : > { %1443 = vmatprep.mubr.bf16.mxu0 %v400_v30  ;;  %v1581_v30 = vld [vmem:[#allocation3 + $0x50] ss:$8 sps:$4 sm:$0xff]  }
  0xb1   : > { %1444 = vmatmul.mubr.bf16.gmra.mrb[12].mxu0 %v401_v31  ;;  %v1608_v31 = vld [vmem:[#allocation3 + $0x10] ss:$8 sps:$4 sm:$0xff]  }
  0xb2   : > { %1447 = vmatprep.mubr.bf16.mxu0 %v402_v32  ;;  %v1582_v32 = vld [vmem:[#allocation3 + $0x64] ss:$8 sps:$4 sm:$0xff]  }
  0xb9   : > { %1448 = vmatmul.mubr.bf16.gmra.mrb[16].mxu0 %v403_v33  ;;  %v1612_v33 = vld [vmem:[#allocation3 + $0x24] ss:$8 sps:$4 sm:$0xff]  }
  0xba   : > { %1451 = vmatprep.mubr.bf16.mxu0 %v404_v34  ;;  %v1584_v34 = vld [vmem:[#allocation3 + $0x60] ss:$8 sps:$4 sm:$0xff]  }
  0xc1   : > { %1452 = vmatmul.mubr.bf16.gmra.mrb[20].mxu0 %v405_v35  ;;  %v1614_v35 = vld [vmem:[#allocation3 + $0x20] ss:$8 sps:$4 sm:$0xff]  }
  0xc2   : > { %1455 = vmatprep.mubr.bf16.mxu0 %v406_v36  ;;  %v1585_v36 = vld [vmem:[#allocation3 + $0x74] ss:$8 sps:$4 sm:$0xff]  }
  0xc9   : > { %1456 = vmatmul.mubr.bf16.gmra.mrb[24].mxu0 %v407_v37  ;;  %v1618_v37 = vld [vmem:[#allocation3 + $0x34] ss:$8 sps:$4 sm:$0xff]  }
  0xca   : > { %1459 = vmatprep.mubr.bf16.mxu0 %v408_v38  ;;  %v1587_v38 = vld [vmem:[#allocation3 + $0x70] ss:$8 sps:$4 sm:$0xff]  }
  0xd1   : > { %1460 = vmatmul.mubr.bf16.gmra.mrb[28].mxu0 %v409_v39  ;;  %v1620_v39 = vld [vmem:[#allocation3 + $0x30] ss:$8 sps:$4 sm:$0xff]  }
  0xd2   : > { %882 = vmatprep.mubr.bf16.mxu0 %v1602_v41  ;;  %v1590_v41 = vld [vmem:[#allocation3 + $0x80] ss:$8 sps:$4 sm:$0xff]  }
 0x16c   : > { %v1433_v42 = vpop.f32.mrb[0].mxu0 }
 0x16d   : > { %v508_v43 = vpop.f32.mrb[1].mxu0 }
 0x16e   : > { %v1434_v44 = vpop.f32.mrb[2].mxu0 }
 0x16f   : > { %v668_v45 = vpack.c.bf16 %v1434_v44, %v1433_v42  ;;  %v511_v46 = vpop.f32.mrb[3].mxu0  ;;  %v1591_v42 = vld [vmem:[#allocation3 + $0x94] ss:$8 sps:$4 sm:$0xff]   ;;  %v1594_v44 = vld [vmem:[#allocation3 + $0xa4] ss:$8 sps:$4 sm:$0xff]  }
 0x170   : > { %v667_v47 = vpack.c.bf16 %v511_v46, %v508_v43  ;;  %v1593_v43 = vld [vmem:[#allocation3 + $0x90] ss:$8 sps:$4 sm:$0xff]   ;;  %v1597_v46 = vld [vmem:[#allocation3 + $0xb4] ss:$8 sps:$4 sm:$0xff]  }
 0x174   : > { %v1437_v48 = vpop.f32.mrb[4].mxu0 }
 0x175   : > { %v524_v49 = vpop.f32.mrb[5].mxu0 }
 0x176   : > { %v1438_v50 = vpop.f32.mrb[6].mxu0 }
 0x177   : > { %v670_v51 = vpack.c.bf16 %v1438_v50, %v1437_v48  ;;  %v527_v52 = vpop.f32.mrb[7].mxu0  ;;  %v1603_v48 = vld [vmem:[#allocation3 + $0xc4] ss:$8 sps:$4 sm:$0xff]   ;;  %v1609_v50 = vld [vmem:[#allocation3 + $0xd4] ss:$8 sps:$4 sm:$0xff]  }
 0x178   : > { %v669_v53 = vpack.c.bf16 %v527_v52, %v524_v49  ;;  %v1605_v49 = vld [vmem:[#allocation3 + $0xc0] ss:$8 sps:$4 sm:$0xff]   ;;  %v1615_v52 = vld [vmem:[#allocation3 + $0xe4] ss:$8 sps:$4 sm:$0xff]  }
 0x17c   : > { %v1441_v54 = vpop.f32.mrb[8].mxu0 }
 0x17d   : > { %v540_v55 = vpop.f32.mrb[9].mxu0 }
 0x17e   : > { %v1442_v56 = vpop.f32.mrb[10].mxu0 }
 0x17f   : > { %v672_v57 = vpack.c.bf16 %v1442_v56, %v1441_v54  ;;  %v543_v58 = vpop.f32.mrb[11].mxu0  ;;  %v1621_v54 = vld [vmem:[#allocation3 + $0xf4] ss:$8 sps:$4 sm:$0xff]  }
 0x180   : > { %v671_v59 = vpack.c.bf16 %v543_v58, %v540_v55  ;;  %v1623_v55 = vld [vmem:[#allocation3 + $0xf0] ss:$8 sps:$4 sm:$0xff]   ;;  %v2013_v58 = vld [vmem:[%s244_s8] ss:$0 sm:$0xff] }
 0x184   : > { %v1445_v60 = vpop.f32.mrb[12].mxu0 }
 0x185   : > { %v556_v61 = vpop.f32.mrb[13].mxu0 }
 0x186   : > { %v1446_v62 = vpop.f32.mrb[14].mxu0 }
 0x187   : > { %v674_v63 = vpack.c.bf16 %v1446_v62, %v1445_v60  ;;  %v559_v0 = vpop.f32.mrb[15].mxu0 }
 0x188   : > { %v673_v1 = vpack.c.bf16 %v559_v0, %v556_v61 }
 0x18c   : > { %v1449_v2 = vpop.f32.mrb[16].mxu0 }
 0x18d   : > { %v572_v3 = vpop.f32.mrb[17].mxu0 }
 0x18e   : > { %v1450_v4 = vpop.f32.mrb[18].mxu0 }
 0x18f   : > { %v676_v5 = vpack.c.bf16 %v1450_v4, %v1449_v2  ;;  %v575_v6 = vpop.f32.mrb[19].mxu0 }
 0x190   : > { %v675_v7 = vpack.c.bf16 %v575_v6, %v572_v3 }
 0x192   : > { %1303 = vmatprep.subr.bf16.mxu0 %v675_v7  ;;  %1463 = vmatprep.subr.bf16.mxu1 %v675_v7 }
 0x193   : > { %1304 = vmatpush3.bf16.msra.mxu0 %v667_v47  ;;  %1471 = vmatpush3.bf16.msra.mxu1 %v667_v47  ;;  %v1599_v47 = vld [vmem:[#allocation3 + $0xb0] ss:$8 sps:$4 sm:$0xff]  }
 0x194   : > { %v1453_v8 = vpop.f32.mrb[20].mxu0  ;;  %1305 = vmatprep.subr.bf16.mxu0 %v676_v5  ;;  %1464 = vmatprep.subr.bf16.mxu1 %v676_v5 }
 0x195   : > { %v588_v9 = vpop.f32.mrb[21].mxu0 }
 0x196   : > { %v1454_v10 = vpop.f32.mrb[22].mxu0 }
 0x197   : > { %v678_v11 = vpack.c.bf16 %v1454_v10, %v1453_v8  ;;  %v591_v12 = vpop.f32.mrb[23].mxu0  ;;  %1306 = vmatpush3.bf16.msra.mxu0 %v668_v45  ;;  %1472 = vmatpush3.bf16.msra.mxu1 %v668_v45  ;;  %v1596_v45 = vld [vmem:[#allocation3 + $0xa0] ss:$8 sps:$4 sm:$0xff]  }
 0x198   : > { %v677_v13 = vpack.c.bf16 %v591_v12, %v588_v9 }
 0x19a   : > { %1307 = vmatprep.subr.bf16.mxu0 %v677_v13  ;;  %1465 = vmatprep.subr.bf16.mxu1 %v677_v13 }
 0x19b   : > { %1308 = vmatpush3.bf16.msra.mxu0 %v669_v53  ;;  %1473 = vmatpush3.bf16.msra.mxu1 %v669_v53  ;;  %v1617_v53 = vld [vmem:[#allocation3 + $0xe0] ss:$8 sps:$4 sm:$0xff]  }
 0x19c   : > { %v1457_v14 = vpop.f32.mrb[24].mxu0  ;;  %1309 = vmatprep.subr.bf16.mxu0 %v678_v11  ;;  %1466 = vmatprep.subr.bf16.mxu1 %v678_v11 }
 0x19d   : > { %v604_v15 = vpop.f32.mrb[25].mxu0 }
 0x19e   : > { %v1458_v16 = vpop.f32.mrb[26].mxu0 }
 0x19f   : > { %v680_v17 = vpack.c.bf16 %v1458_v16, %v1457_v14  ;;  %v607_v18 = vpop.f32.mrb[27].mxu0  ;;  %1310 = vmatpush3.bf16.msra.mxu0 %v670_v51  ;;  %1474 = vmatpush3.bf16.msra.mxu1 %v670_v51  ;;  %v1611_v51 = vld [vmem:[#allocation3 + $0xd0] ss:$8 sps:$4 sm:$0xff]  }
 0x1a0   : > { %v679_v19 = vpack.c.bf16 %v607_v18, %v604_v15 }
 0x1a2   : > { %1311 = vmatprep.subr.bf16.mxu0 %v679_v19  ;;  %1467 = vmatprep.subr.bf16.mxu1 %v679_v19 }
 0x1a3   : > { %1312 = vmatpush3.bf16.msra.mxu0 %v671_v59  ;;  %1475 = vmatpush3.bf16.msra.mxu1 %v671_v59 }
 0x1a4   : > { %v1461_v20 = vpop.f32.mrb[28].mxu0  ;;  %1313 = vmatprep.subr.bf16.mxu0 %v680_v17  ;;  %1468 = vmatprep.subr.bf16.mxu1 %v680_v17 }
 0x1a5   : > { %v620_v21 = vpop.f32.mrb[29].mxu0 }
 0x1a6   : > { %v1462_v22 = vpop.f32.mrb[30].mxu0 }
 0x1a7   : > { %v682_v23 = vpack.c.bf16 %v1462_v22, %v1461_v20  ;;  %v623_v24 = vpop.f32.mrb[31].mxu0  ;;  %1314 = vmatpush3.bf16.msra.mxu0 %v672_v57  ;;  %1476 = vmatpush3.bf16.msra.mxu1 %v672_v57 }
 0x1a8   : > { %v681_v25 = vpack.c.bf16 %v623_v24, %v620_v21 }
 0x1aa   : > { %1315 = vmatprep.subr.bf16.mxu0 %v681_v25  ;;  %1469 = vmatprep.subr.bf16.mxu1 %v681_v25 }
 0x1ab   : > { %1316 = vmatpush3.bf16.msra.mxu0 %v673_v1  ;;  %1477 = vmatpush3.bf16.msra.mxu1 %v673_v1 }
 0x1ac   : > { %1317 = vmatprep.subr.bf16.mxu0 %v682_v23  ;;  %1470 = vmatprep.subr.bf16.mxu1 %v682_v23 }
 0x1af   : > { %1318 = vmatpush3.bf16.msra.mxu0 %v674_v63  ;;  %1478 = vmatpush3.bf16.msra.mxu1 %v674_v63 }
 0x1b2   : > { %915 = vmatmul.mubr.bf16.vlgmr.msra.gmra.mrb[0].mxu1 %v1576_v26  ;;  %883 = vmatmul.mubr.bf16.vlgmr.msra.gmra.mrb[32].mxu0 %v1600_v27 }
 0x1b3   : > { %922 = vmatprep.mubr.bf16.mxu1 %v1579_v28  ;;  %890 = vmatprep.mubr.bf16.mxu0 %v1606_v29 }
 0x1ba   : > { %923 = vmatmul.mubr.bf16.gmra.mrb[4].mxu1 %v1581_v30  ;;  %891 = vmatmul.mubr.bf16.gmra.mrb[36].mxu0 %v1608_v31 }
 0x1bb   : > { %930 = vmatprep.mubr.bf16.mxu1 %v1582_v32  ;;  %898 = vmatprep.mubr.bf16.mxu0 %v1612_v33 }
 0x1c2   : > { %931 = vmatmul.mubr.bf16.gmra.mrb[8].mxu1 %v1584_v34  ;;  %899 = vmatmul.mubr.bf16.gmra.mrb[40].mxu0 %v1614_v35 }
 0x1c3   : > { %938 = vmatprep.mubr.bf16.mxu1 %v1585_v36  ;;  %906 = vmatprep.mubr.bf16.mxu0 %v1618_v37 }
 0x1ca   : > { %939 = vmatmul.mubr.bf16.gmra.mrb[12].mxu1 %v1587_v38  ;;  %907 = vmatmul.mubr.bf16.gmra.mrb[44].mxu0 %v1620_v39 }
 0x1cb   : > { %946 = vmatprep.mubr.bf16.mxu1 %v1588_v40 }
 0x1d2   : > { %947 = vmatmul.mubr.bf16.gmra.mrb[16].mxu1 %v1590_v41 }
 0x1d3   : > { %954 = vmatprep.mubr.bf16.mxu1 %v1591_v42 }
 0x1da   : > { %955 = vmatmul.mubr.bf16.gmra.mrb[20].mxu1 %v1593_v43 }
 0x1db   : > { %962 = vmatprep.mubr.bf16.mxu1 %v1594_v44 }
 0x1e2   : > { %963 = vmatmul.mubr.bf16.gmra.mrb[24].mxu1 %v1596_v45 }
 0x1e3   : > { %970 = vmatprep.mubr.bf16.mxu1 %v1597_v46 }
 0x1ea   : > { %971 = vmatmul.mubr.bf16.gmra.mrb[28].mxu1 %v1599_v47 }
 0x1eb   : > { %978 = vmatprep.mubr.bf16.mxu1 %v1603_v48 }
 0x1f2   : > { %979 = vmatmul.mubr.bf16.gmra.mrb[32].mxu1 %v1605_v49 }
 0x1f3   : > { %986 = vmatprep.mubr.bf16.mxu1 %v1609_v50 }
 0x1fa   : > { %987 = vmatmul.mubr.bf16.gmra.mrb[36].mxu1 %v1611_v51 }
 0x1fb   : > { %994 = vmatprep.mubr.bf16.mxu1 %v1615_v52 }
 0x202   : > { %995 = vmatmul.mubr.bf16.gmra.mrb[40].mxu1 %v1617_v53 }
 0x203   : > { %1002 = vmatprep.mubr.bf16.mxu1 %v1621_v54 }
 0x20a   : > { %1003 = vmatmul.mubr.bf16.gmra.mrb[44].mxu1 %v1623_v55 }
 0x285   : > { %v1343_v56 = vpop.f32.mrb[0].mxu1  ;;  %v1319_v57 = vpop.f32.mrb[32].mxu0 }
 0x286   : > { %v1344_v59 = vpop.f32.mrb[1].mxu1  ;;  %v1320_v60 = vpop.f32.mrb[33].mxu0 }
 0x287   : > { %v1345_v61 = vadd.f32 %v1344_v59, %v1343_v56  ;;  %v1346_v62 = vpop.f32.mrb[2].mxu1  ;;  %v1321_v63 = vadd.f32 %v1320_v60, %v1319_v57  ;;  %v1322_v0 = vpop.f32.mrb[34].mxu0 }
 0x288   : > { %v1347_v1 = vpop.f32.mrb[3].mxu1  ;;  %v1323_v2 = vpop.f32.mrb[35].mxu0 }
 0x289   : > { %v2016_v3 = vadd.f32 %v1345_v61, %v2013_v58  ;;  %v1348_v4 = vadd.f32 %v1347_v1, %v1346_v62  ;;  %v2019_v5 = vadd.f32 %v1321_v63, %v2013_v58  ;;  %v1324_v6 = vadd.f32 %v1323_v2, %v1322_v0 }
 0x28b   : > { %v2022_v7 = vadd.f32 %v1348_v4, %v2013_v58  ;;  %v2025_v8 = vadd.f32 %v1324_v6, %v2013_v58 }
 0x28d   : > { %v1349_v9 = vpop.f32.mrb[4].mxu1  ;;  %v1325_v10 = vpop.f32.mrb[36].mxu0 }
 0x28e   : > { %v1350_v11 = vpop.f32.mrb[5].mxu1  ;;  %v1326_v12 = vpop.f32.mrb[37].mxu0 }
 0x28f   : > { %v1351_v13 = vadd.f32 %v1350_v11, %v1349_v9  ;;  %v1352_v14 = vpop.f32.mrb[6].mxu1  ;;  %v1327_v15 = vadd.f32 %v1326_v12, %v1325_v10  ;;  %v1328_v16 = vpop.f32.mrb[38].mxu0 }
 0x290   : > { %v1353_v17 = vpop.f32.mrb[7].mxu1  ;;  %v1329_v18 = vpop.f32.mrb[39].mxu0 }
 0x291   : > { %v2028_v19 = vadd.f32 %v1351_v13, %v2013_v58  ;;  %v1354_v20 = vadd.f32 %v1353_v17, %v1352_v14  ;;  %v2031_v21 = vadd.f32 %v1327_v15, %v2013_v58  ;;  %v1330_v22 = vadd.f32 %v1329_v18, %v1328_v16 }
 0x293   : > { %v2034_v23 = vadd.f32 %v1354_v20, %v2013_v58  ;;  %v2037_v24 = vadd.f32 %v1330_v22, %v2013_v58 }
 0x295   : > { %v1355_v25 = vpop.f32.mrb[8].mxu1  ;;  %v1331_v26 = vpop.f32.mrb[40].mxu0 }
 0x296   : > { %v1356_v27 = vpop.f32.mrb[9].mxu1  ;;  %v1332_v28 = vpop.f32.mrb[41].mxu0 }
 0x297   : > { %v1357_v29 = vadd.f32 %v1356_v27, %v1355_v25  ;;  %v1358_v30 = vpop.f32.mrb[10].mxu1  ;;  %v1333_v31 = vadd.f32 %v1332_v28, %v1331_v26  ;;  %v1334_v32 = vpop.f32.mrb[42].mxu0 }
 0x298   : > { %v1359_v33 = vpop.f32.mrb[11].mxu1  ;;  %v1335_v34 = vpop.f32.mrb[43].mxu0 }
 0x299   : > { %v2040_v35 = vadd.f32 %v1357_v29, %v2013_v58  ;;  %v1360_v36 = vadd.f32 %v1359_v33, %v1358_v30  ;;  %v2043_v37 = vadd.f32 %v1333_v31, %v2013_v58  ;;  %v1336_v38 = vadd.f32 %v1335_v34, %v1334_v32 }
 0x29b   : > { %v2046_v39 = vadd.f32 %v1360_v36, %v2013_v58  ;;  %v2049_v40 = vadd.f32 %v1336_v38, %v2013_v58 }
 0x29d   : > { %v1361_v41 = vpop.f32.mrb[12].mxu1  ;;  %v1337_v42 = vpop.f32.mrb[44].mxu0 }
 0x29e   : > { %v1362_v43 = vpop.f32.mrb[13].mxu1  ;;  %v1338_v44 = vpop.f32.mrb[45].mxu0 }
 0x29f   : > { %v1363_v45 = vadd.f32 %v1362_v43, %v1361_v41  ;;  %v1364_v46 = vpop.f32.mrb[14].mxu1  ;;  %v1339_v47 = vadd.f32 %v1338_v44, %v1337_v42  ;;  %v1340_v48 = vpop.f32.mrb[46].mxu0 }
 0x2a0   : > { %v1365_v49 = vpop.f32.mrb[15].mxu1  ;;  %v1341_v50 = vpop.f32.mrb[47].mxu0 }
 0x2a1   : > { %v2052_v51 = vadd.f32 %v1363_v45, %v2013_v58  ;;  %v1366_v52 = vadd.f32 %v1365_v49, %v1364_v46  ;;  %v2055_v53 = vadd.f32 %v1339_v47, %v2013_v58  ;;  %v1342_v54 = vadd.f32 %v1341_v50, %v1340_v48 }
 0x2a3   : > { %v2058_v55 = vadd.f32 %v1366_v52, %v2013_v58  ;;  %v2061_v56 = vadd.f32 %v1342_v54, %v2013_v58 }
 0x2a5   : > { %v1367_v57 = vpop.f32.mrb[16].mxu1 }
 0x2a6   : > { %v1368_v59 = vpop.f32.mrb[17].mxu1 }
 0x2a7   : > { %v1369_v60 = vadd.f32 %v1368_v59, %v1367_v57  ;;  %v1370_v61 = vpop.f32.mrb[18].mxu1 }
 0x2a8   : > { %v1371_v62 = vpop.f32.mrb[19].mxu1 }
 0x2a9   : > { %v2064_v63 = vadd.f32 %v1369_v60, %v2013_v58  ;;  %v1372_v0 = vadd.f32 %v1371_v62, %v1370_v61 }
 0x2ab   : > { %v2067_v1 = vadd.f32 %v1372_v0, %v2013_v58 }
 0x2ad   : > { %v1373_v2 = vpop.f32.mrb[20].mxu1 }
 0x2ae   : > { %v1374_v4 = vpop.f32.mrb[21].mxu1 }
 0x2af   : > { %v1375_v6 = vadd.f32 %v1374_v4, %v1373_v2  ;;  %v1376_v9 = vpop.f32.mrb[22].mxu1 }
 0x2b0   : > { %v1377_v10 = vpop.f32.mrb[23].mxu1 }
 0x2b1   : > { %v2070_v11 = vadd.f32 %v1375_v6, %v2013_v58  ;;  %v1378_v12 = vadd.f32 %v1377_v10, %v1376_v9 }
 0x2b3   : > { %v2073_v13 = vadd.f32 %v1378_v12, %v2013_v58 }
 0x2b5   : > { %v1379_v14 = vpop.f32.mrb[24].mxu1 }
 0x2b6   : > { %v1380_v15 = vpop.f32.mrb[25].mxu1 }
 0x2b7   : > { %v1381_v16 = vadd.f32 %v1380_v15, %v1379_v14  ;;  %v1382_v17 = vpop.f32.mrb[26].mxu1 }
 0x2b8   : > { %v1383_v18 = vpop.f32.mrb[27].mxu1 }
 0x2b9   : > { %v2076_v20 = vadd.f32 %v1381_v16, %v2013_v58  ;;  %v1384_v22 = vadd.f32 %v1383_v18, %v1382_v17 }
 0x2bb   : > { %v2079_v25 = vadd.f32 %v1384_v22, %v2013_v58  ;;  %v1015_v22 = vmax.f32 (!%p1272_p11), %v2019_v5, 0.0 }
 0x2bd   : > { %v1385_v26 = vpop.f32.mrb[28].mxu1 }
 0x2be   : > { %v1386_v27 = vpop.f32.mrb[29].mxu1 }
 0x2bf   : > { %v1387_v28 = vadd.f32 %v1386_v27, %v1385_v26  ;;  %v1388_v29 = vpop.f32.mrb[30].mxu1  ;;  %v1016_v26 = vmax.f32 (!%p1272_p11), %v2025_v8, 0.0  ;;  %v1017_v27 = vmax.f32 (!%p1272_p11), %v2031_v21, 0.0 }
 0x2c0   : > { %v1389_v30 = vpop.f32.mrb[31].mxu1 }
 0x2c1   : > { %v2082_v31 = vadd.f32 %v1387_v28, %v2013_v58  ;;  %v1390_v32 = vadd.f32 %v1389_v30, %v1388_v29  ;;  %v1018_v28 = vmax.f32 (!%p1272_p11), %v2037_v24, 0.0  ;;  %v1019_v29 = vmax.f32 (!%p1272_p11), %v2043_v37, 0.0 }
 0x2c2   : > { %v1020_v30 = vmax.f32 (!%p1272_p11), %v2049_v40, 0.0 }
 0x2c3   : > { %v2085_v33 = vadd.f32 %v1390_v32, %v2013_v58  ;;  %v1021_v32 = vmax.f32 (!%p1272_p11), %v2055_v53, 0.0 }
 0x2c5   : > { %v1391_v34 = vpop.f32.mrb[32].mxu1 }
 0x2c6   : > { %v1392_v36 = vpop.f32.mrb[33].mxu1 }
 0x2c7   : > { %v1393_v38 = vadd.f32 %v1392_v36, %v1391_v34  ;;  %v1394_v41 = vpop.f32.mrb[34].mxu1  ;;  %v1047_v34 = vpack.c.bf16 (!%p1272_p11), %v1016_v26, %v1015_v22  ;;  %v1048_v36 = vpack.c.bf16 (!%p1272_p11), %v1018_v28, %v1017_v27  ;;  %v1038_v26 = vmax.f32 (!%p1272_p11), %v2085_v33, 0.0 }
 0x2c8   : > { %v1395_v42 = vpop.f32.mrb[35].mxu1 }
 0x2c9   : > { %v2088_v43 = vadd.f32 %v1393_v38, %v2013_v58  ;;  %v1396_v44 = vadd.f32 %v1395_v42, %v1394_v41  ;;  %v1023_v38 = vmax.f32 (!%p1272_p11), %v2016_v3, 0.0  ;;  %v1024_v41 = vmax.f32 (!%p1272_p11), %v2022_v7, 0.0  ;;  %1063 = vst [vmem:[#allocation2] sm:$0xff] (!%p1272_p11), %v1047_v34  ;;  %1064 = vst [vmem:[#allocation2 + $0x8] sm:$0xff] (!%p1272_p11), %v1048_v36 }
 0x2ca   : > { %v1049_v42 = vpack.c.bf16 (!%p1272_p11), %v1020_v30, %v1019_v29 }
 0x2cb   : > { %v2091_v45 = vadd.f32 %v1396_v44, %v2013_v58  ;;  %v1039_v27 = vmax.f32 (!%p1272_p11), %v2088_v43, 0.0 }
 0x2cc   : > { %1065 = vst [vmem:[#allocation2 + $0x10] sm:$0xff] (!%p1272_p11), %v1049_v42 }
 0x2cd   : > { %v1397_v46 = vpop.f32.mrb[36].mxu1  ;;  %v1040_v28 = vmax.f32 (!%p1272_p11), %v2091_v45, 0.0 }
 0x2ce   : > { %v1398_v47 = vpop.f32.mrb[37].mxu1 }
 0x2cf   : > { %v1399_v48 = vadd.f32 %v1398_v47, %v1397_v46  ;;  %v1400_v49 = vpop.f32.mrb[38].mxu1  ;;  %v1025_v46 = vmax.f32 (!%p1272_p11), %v2028_v19, 0.0  ;;  %v1026_v47 = vmax.f32 (!%p1272_p11), %v2034_v23, 0.0  ;;  %v1059_v36 = vpack.c.bf16 (!%p1272_p11), %v1040_v28, %v1039_v27 }
 0x2d0   : > { %v1401_v50 = vpop.f32.mrb[39].mxu1 }
 0x2d1   : > { %v2094_v52 = vadd.f32 %v1399_v48, %v2013_v58  ;;  %v1402_v54 = vadd.f32 %v1401_v50, %v1400_v49  ;;  %v1051_v48 = vpack.c.bf16 (!%p1272_p11), %v1024_v41, %v1023_v38  ;;  %v1027_v49 = vmax.f32 (!%p1272_p11), %v2040_v35, 0.0  ;;  %1075 = vst [vmem:[#allocation2 + $0x60] sm:$0xff] (!%p1272_p11), %v1059_v36 }
 0x2d2   : > { %v1028_v50 = vmax.f32 (!%p1272_p11), %v2046_v39, 0.0 }
 0x2d3   : > { %v2097_v57 = vadd.f32 %v1402_v54, %v2013_v58  ;;  %v1029_v54 = vmax.f32 (!%p1272_p11), %v2052_v51, 0.0  ;;  %1067 = vst [vmem:[#allocation2 + $0x20] sm:$0xff] (!%p1272_p11), %v1051_v48  ;;  %v1041_v30 = vmax.f32 (!%p1272_p11), %v2094_v52, 0.0 }
 0x2d5   : > { %v1403_v59 = vpop.f32.mrb[40].mxu1 }
 0x2d6   : > { %v1404_v60 = vpop.f32.mrb[41].mxu1 }
 0x2d7   : > { %v1405_v61 = vadd.f32 %v1404_v60, %v1403_v59  ;;  %v1406_v62 = vpop.f32.mrb[42].mxu1  ;;  %v1052_v59 = vpack.c.bf16 (!%p1272_p11), %v1026_v47, %v1025_v46  ;;  %v1030_v60 = vmax.f32 (!%p1272_p11), %v2058_v55, 0.0 }
 0x2d8   : > { %v1407_v0 = vpop.f32.mrb[43].mxu1 }
 0x2d9   : > { %v2100_v2 = vadd.f32 %v1405_v61, %v2013_v58  ;;  %v1408_v4 = vadd.f32 %v1407_v0, %v1406_v62  ;;  %v1031_v61 = vmax.f32 (!%p1272_p11), %v2064_v63, 0.0  ;;  %v1032_v62 = vmax.f32 (!%p1272_p11), %v2067_v1, 0.0  ;;  %1068 = vst [vmem:[#allocation2 + $0x28] sm:$0xff] (!%p1272_p11), %v1052_v59 }
 0x2da   : > { %v1053_v0 = vpack.c.bf16 (!%p1272_p11), %v1028_v50, %v1027_v49 }
 0x2db   : > { %v2103_v6 = vadd.f32 %v1408_v4, %v2013_v58  ;;  %v1033_v4 = vmax.f32 (!%p1272_p11), %v2070_v11, 0.0 }
 0x2dc   : > { %1069 = vst [vmem:[#allocation2 + $0x30] sm:$0xff] (!%p1272_p11), %v1053_v0 }
 0x2dd   : > { %v1409_v9 = vpop.f32.mrb[44].mxu1  ;;  %1014 = sbr.rel (%p1272_p11) target bundleno = 748 (0x2ec), region = 56  ;;  %v1044_v38 = vmax.f32 (!%p1272_p11), %v2103_v6, 0.0 }
 0x2de   : > { %v1410_v10 = vpop.f32.mrb[45].mxu1 }
 0x2df   : > { %v1411_v12 = vadd.f32 %v1410_v10, %v1409_v9  ;;  %v1412_v14 = vpop.f32.mrb[46].mxu1  ;;  %v1034_v9 = vmax.f32 (!%p1272_p11), %v2073_v13, 0.0  ;;  %v1035_v10 = vmax.f32 (!%p1272_p11), %v2076_v20, 0.0 }
 0x2e0   : > { %v1413_v15 = vpop.f32.mrb[47].mxu1 }
 0x2e1   : > { %v2106_v16 = vadd.f32 %v1411_v12, %v2013_v58  ;;  %v1414_v17 = vadd.f32 %v1413_v15, %v1412_v14  ;;  %v1054_v12 = vpack.c.bf16 (!%p1272_p11), %v1030_v60, %v1029_v54  ;;  %v1055_v14 = vpack.c.bf16 (!%p1272_p11), %v1032_v62, %v1031_v61 }
 0x2e2   : > { %v1036_v15 = vmax.f32 (!%p1272_p11), %v2079_v25, 0.0  ;;  %v1056_v22 = vpack.c.bf16 (!%p1272_p11), %v1034_v9, %v1033_v4 }
 0x2e3   : > { %v2109_v18 = vadd.f32 %v1414_v17, %v2013_v58  ;;  %v1022_v58 = vmax.f32 (!%p1272_p11), %v2061_v56, 0.0  ;;  %v1037_v17 = vmax.f32 (!%p1272_p11), %v2082_v31, 0.0  ;;  %1070 = vst [vmem:[#allocation2 + $0x38] sm:$0xff] (!%p1272_p11), %v1054_v12  ;;  %1071 = vst [vmem:[#allocation2 + $0x40] sm:$0xff] (!%p1272_p11), %v1055_v14  ;;  %v1045_v41 = vmax.f32 (!%p1272_p11), %v2106_v16, 0.0 }
 0x2e4   : > { %v1057_v29 = vpack.c.bf16 %v1036_v15, %v1035_v10  ;;  %1072 = vst [vmem:[#allocation2 + $0x48] sm:$0xff] %v1056_v22 }
 0x2e5   : > { %v1050_v44 = vpack.c.bf16 %v1022_v58, %v1021_v32  ;;  %v1042_v32 = vmax.f32 %v2097_v57, 0.0  ;;  %v1043_v58 = vmax.f32 %v2100_v2, 0.0  ;;  %v1058_v34 = vpack.c.bf16 %v1038_v26, %v1037_v17 }
 0x2e6   : > { %1073 = vst [vmem:[#allocation2 + $0x50] sm:$0xff] %v1057_v29 }
 0x2e7   : > { %1066 = vst [vmem:[#allocation2 + $0x18] sm:$0xff] %v1050_v44  ;;  %v1060_v42 = vpack.c.bf16 %v1042_v32, %v1041_v30  ;;  %v1046_v44 = vmax.f32 %v2109_v18, 0.0  ;;  %1074 = vst [vmem:[#allocation2 + $0x58] sm:$0xff] %v1058_v34  ;;  %v1061_v46 = vpack.c.bf16 %v1044_v38, %v1043_v58 }
 0x2e9   : > { %1076 = vst [vmem:[#allocation2 + $0x68] sm:$0xff] %v1060_v42  ;;  %v1062_v47 = vpack.c.bf16 %v1046_v44, %v1045_v41  ;;  %1077 = vst [vmem:[#allocation2 + $0x70] sm:$0xff] %v1061_v46 }
 0x2eb   : > { %1078 = vst [vmem:[#allocation2 + $0x78] sm:$0xff] %v1062_v47 }
 0x2ec PF: > { %p1273_p13 = scmp.ne.s32.totalorder %s1838_s19, 2 }
 0x2ed   : > { %1083 = vst [vmem:[#allocation9] sm:$0xff] (!%p1273_p13), %v2019_v5  ;;  %1084 = vst [vmem:[#allocation9 + $0x8] sm:$0xff] (!%p1273_p13), %v2025_v8 }
 0x2ee   : > { %1082 = sbr.rel (%p1273_p13) target bundleno = 765 (0x2fd), region = 60  ;;  %1085 = vst [vmem:[#allocation9 + $0x10] sm:$0xff] (!%p1273_p13), %v2031_v21  ;;  %1086 = vst [vmem:[#allocation9 + $0x18] sm:$0xff] (!%p1273_p13), %v2037_v24 }
 0x2ef   : > { %1087 = vst [vmem:[#allocation9 + $0x20] sm:$0xff] (!%p1273_p13), %v2043_v37  ;;  %1088 = vst [vmem:[#allocation9 + $0x28] sm:$0xff] (!%p1273_p13), %v2049_v40 }
 0x2f0   : > { %1089 = vst [vmem:[#allocation9 + $0x30] sm:$0xff] (!%p1273_p13), %v2055_v53  ;;  %1090 = vst [vmem:[#allocation9 + $0x38] sm:$0xff] (!%p1273_p13), %v2061_v56 }
 0x2f1   : > { %1091 = vst [vmem:[#allocation9 + $0x40] sm:$0xff] (!%p1273_p13), %v2016_v3  ;;  %1092 = vst [vmem:[#allocation9 + $0x48] sm:$0xff] (!%p1273_p13), %v2022_v7 }
 0x2f2   : > { %1093 = vst [vmem:[#allocation9 + $0x50] sm:$0xff] (!%p1273_p13), %v2028_v19  ;;  %1094 = vst [vmem:[#allocation9 + $0x58] sm:$0xff] (!%p1273_p13), %v2034_v23 }
 0x2f3   : > { %1095 = vst [vmem:[#allocation9 + $0x60] sm:$0xff] (!%p1273_p13), %v2040_v35  ;;  %1096 = vst [vmem:[#allocation9 + $0x68] sm:$0xff] (!%p1273_p13), %v2046_v39 }
 0x2f4   : > { %1097 = vst [vmem:[#allocation9 + $0x70] sm:$0xff] (!%p1273_p13), %v2052_v51  ;;  %1098 = vst [vmem:[#allocation9 + $0x78] sm:$0xff] (!%p1273_p13), %v2058_v55 }
 0x2f5   : > { %1099 = vst [vmem:[#allocation9 + $0x80] sm:$0xff] %v2064_v63  ;;  %1100 = vst [vmem:[#allocation9 + $0x88] sm:$0xff] %v2067_v1 }
 0x2f6   : > { %1101 = vst [vmem:[#allocation9 + $0x90] sm:$0xff] %v2070_v11  ;;  %1102 = vst [vmem:[#allocation9 + $0x98] sm:$0xff] %v2073_v13 }
 0x2f7   : > { %1103 = vst [vmem:[#allocation9 + $0xa0] sm:$0xff] %v2076_v20  ;;  %1104 = vst [vmem:[#allocation9 + $0xa8] sm:$0xff] %v2079_v25 }
 0x2f8   : > { %1105 = vst [vmem:[#allocation9 + $0xb0] sm:$0xff] %v2082_v31  ;;  %1106 = vst [vmem:[#allocation9 + $0xb8] sm:$0xff] %v2085_v33 }
 0x2f9   : > { %1107 = vst [vmem:[#allocation9 + $0xc0] sm:$0xff] %v2088_v43  ;;  %1108 = vst [vmem:[#allocation9 + $0xc8] sm:$0xff] %v2091_v45 }
 0x2fa   : > { %1109 = vst [vmem:[#allocation9 + $0xd0] sm:$0xff] %v2094_v52  ;;  %1110 = vst [vmem:[#allocation9 + $0xd8] sm:$0xff] %v2097_v57 }
 0x2fb   : > { %1111 = vst [vmem:[#allocation9 + $0xe0] sm:$0xff] %v2100_v2  ;;  %1112 = vst [vmem:[#allocation9 + $0xe8] sm:$0xff] %v2103_v6 }
 0x2fc   : > { %1113 = vst [vmem:[#allocation9 + $0xf0] sm:$0xff] %v2106_v16  ;;  %1114 = vst [vmem:[#allocation9 + $0xf8] sm:$0xff] %v2109_v18 }
 0x2fd PF: > { %p1509_p12 = scmp.eq.s32.totalorder %s1838_s19, 2  ;;  %s1791_s24 = smov [#allocation9]  }
 0x2fe   : > { %s1121_s18 = sshll.u32 %s1791_s24, 4  ;;  %s1122_s18 = int_to_ptr.vmem [resolvable:$true] %s1121_s18 }
 0x2ff   : > { %s1710_s10 = scalar_lea.vmem %s1122_s18, 4096  ;;  %p1717_p5 = scmp.lt.s32.totalorder %s1122_s18, %s1122_s18 }
 0x300   : > { %p1711_p8 = scmp.ne.s32.totalorder %s1122_s18, %s1710_s10  ;;  %p1718_p9 = scmp.lt.s32.totalorder %s1710_s10, %s1710_s10 }
 0x302   : > { %p1712_p10 = pnand %p1711_p8, %p1509_p12  ;;  %p1719_p1 = por %p1718_p9, %p1717_p5 }
 0x304   : > { %p1713_p0 = pneg %p1712_p10 }
 0x306   : > { %p1720_p3 = pnand %p1719_p1, %p1713_p0 }
 0x308   : > { %1723 = shalt.err (!%p1720_p3)
}
 0x309   : > { %s1724_s14 = scalar_lea.hbm %s2217_s4, 4096 }
 0x30a   : > { %p1725_p6 = scmp.ne.s32.totalorder %s2217_s4, %s1724_s14  ;;  %p1730_p7 = scmp.lt.u32.totalorder %s1724_s14, %s2217_s4 }
 0x30c   : > { %p1726_p2 = pnand %p1725_p6, %p1509_p12 }
 0x30e   : > { %p1727_p4 = pneg %p1726_p2 }
 0x310   : > { %p1732_p11 = pnand %p1730_p7, %p1727_p4 }
 0x312   : > { %1735 = shalt.err (!%p1732_p11)
}
 0x313   : > { %s1792_s30 = smov 128   ;;  %s1793_s11 = smov 8  }
 0x314   : > { %1490 = dma.vmem_to_hbm [thread:$0]  (%p1509_p12), %s1122_s18, 4096, %s2217_s4, [#allocation5], %s1792_s30, %s1792_s30, %s1793_s11  }
 0x315   : > { %1765 = dma.done.wait (%p1509_p12), [#allocation5], 4096  }
 0x316   : > { %1767 = vsyncadd (%p1509_p12), [#allocation5], 4294963200 }
 0x317 PF: > { %p14_p13 = scmp.ge.s32.totalorder %s1841_s20, 5   ;;  %s2235_s15 = smov %s1774_s16 }
 0x318   : > { %s2236_s16 = smov %s1778_s17  ;;  %s2237_s17 = smov %s1851_s23 }
 0x319   : > { %s2238_s18 = smov %s1841_s20  ;;  %16 = sbr.rel (!%p14_p13) target bundleno = 4 (0x4), region = 95 }
 0x320   :  { %1137 = vsyncpa [#allocation4], 1 }
 0x321   :  { %1139 = vsyncpa [#allocation4 + $0x1], 1 }
 0x322   :  { %1140 = vsyncpa [#allocation7], 1 }
 0x323   :  { %1141 = vsyncpa [#allocation5], 1 }
 0x324   :  { %1143 = vsyncpa [#allocation5 + $0x1], 1 }

</bundles_post_ra>
